<compile_context>
chip_gen: v7x
topology: tpu7x:2x2x1
jax: 0.10.0
libtpu: 0.0.40
codegen_flags: <defaults>
</compile_context>

<pallas_src>
import jax
import jax.numpy as jnp
from jax.experimental import pallas as pl
from jax.experimental.pallas import tpu as pltpu

_LANES = 128
_SUBLANES = 8


def _wmse_kernel(x_ref, ae_ref, seg_ref, out_ref, acc_ref):
    """One (sample i, hw-split p, hw-tile j) step.

    acc_ref: (3, S, 128) f32 dense accumulator
      acc[0] : count of positive (seg > 0.5) pixels
      acc[1] : sum over C of squared error on positive pixels
      acc[2] : sum over C of squared error on negative pixels
    """
    j = pl.program_id(2)

    @pl.when(j == 0)
    def _():
        acc_ref[...] = jnp.zeros_like(acc_ref)

    seg = seg_ref[0, 0]                          # (S, 128), native dtype
    pos = seg > 0.5                              # (S, 128) bool

    x = x_ref[0].astype(jnp.float32)             # (C, S, 128)
    ae = ae_ref[0].astype(jnp.float32)           # (C, S, 128)
    d = ae - x
    # Reduce over channels first, then mask the (S,128) result (cheaper than
    # masking the full (C,S,128) tile).
    d2sum = jnp.sum(d * d, axis=0)               # (S, 128)

    acc_ref[0] += pos.astype(jnp.float32)
    acc_ref[1] += jnp.where(pos, d2sum, 0.0)
    acc_ref[2] += jnp.where(pos, 0.0, d2sum)

    # Fold the per-sample partial to a narrow lane-dense (3, 128) slab and
    # write it back once, on the last HW tile of this split.
    @pl.when(j == pl.num_programs(2) - 1)
    def _():
        out_ref[...] = jnp.sum(acc_ref[...], axis=1).reshape(out_ref.shape)


def _pick_tile_rows(rows, c, itemsize, budget_bytes=4 * 1024 * 1024):
    """Largest multiple of 8 dividing `rows` s.t. the (c, S, 128) input block
    stays under `budget_bytes` (4 MiB keeps 2 inputs x 2 buffers + scratch
    well inside v7x's 64 MiB VMEM while amortizing per-step overhead)."""
    per_row = max(1, c * _LANES * itemsize)
    max_rows = max(_SUBLANES, (budget_bytes // per_row) // _SUBLANES * _SUBLANES)
    if rows <= max_rows:
        return rows
    best = _SUBLANES
    s = _SUBLANES
    while s <= max_rows:
        if rows % s == 0:
            best = s
        s += _SUBLANES
    return best


def weighted_mse(x, out_ae, out_seg):
    """x, out_ae: (N, C, H, W); out_seg: (N, 1, H, W). Returns scalar loss."""
    n, c, h, w = x.shape
    hw = h * w

    # Pad the flattened HW axis to a multiple of 8*128 so tiles are sublane-
    # and lane-dense.  Padding is numerically neutral: x == out_ae == 0 gives
    # d2 = 0, seg = 0 is not positive, and neg_num is derived from the
    # unpadded total below.
    pad = (-hw) % (_SUBLANES * _LANES)
    hw_pad = hw + pad
    rows = hw_pad // _LANES

    def _prep(a, ch):
        a = a.reshape(n, ch, hw)
        if pad:
            a = jnp.pad(a, ((0, 0), (0, 0), (0, pad)))
        return a.reshape(n, ch, rows, _LANES)

    # Keep native dtype in HBM (kernel is HBM-bandwidth bound); upcast in VMEM.
    x2 = _prep(x, c)
    ae2 = _prep(out_ae, c)
    seg2 = _prep(out_seg, 1)

    s_rows = _pick_tile_rows(rows, c, jnp.dtype(x2.dtype).itemsize)
    n_tiles = rows // s_rows

    # Split the HW reduction into two independent halves when possible so both
    # TensorCores can stream on v7x even for N == 1 (no-op on v5e/v6e).
    n_splits = 2 if (n_tiles % 2 == 0 and n_tiles >= 2) else 1
    tps = n_tiles // n_splits

    partials = pl.pallas_call(
        _wmse_kernel,
        out_shape=jax.ShapeDtypeStruct((n, n_splits, 3, _LANES), jnp.float32),
        grid_spec=pltpu.PrefetchScalarGridSpec(
            num_scalar_prefetch=0,
            grid=(n, n_splits, tps),
            in_specs=[
                pl.BlockSpec((1, c, s_rows, _LANES),
                             lambda i, p, j: (i, 0, p * tps + j, 0)),
                pl.BlockSpec((1, c, s_rows, _LANES),
                             lambda i, p, j: (i, 0, p * tps + j, 0)),
                pl.BlockSpec((1, 1, s_rows, _LANES),
                             lambda i, p, j: (i, 0, p * tps + j, 0)),
            ],
            out_specs=pl.BlockSpec((1, 1, 3, _LANES),
                                   lambda i, p, j: (i, p, 0, 0)),
            scratch_shapes=[pltpu.VMEM((3, s_rows, _LANES), jnp.float32)],
        ),
        compiler_params=pltpu.CompilerParams(
            # (sample, hw-split) axes are truly parallel (independent partial
            # outputs); the hw-tile axis is the reduction.
            dimension_semantics=("parallel", "parallel", "arbitrary"),
            vmem_limit_bytes=48 * 1024 * 1024,
        ),
    )(x2, ae2, seg2)

    # Single pass over the narrow folded partials.
    sums = jnp.sum(partials, axis=(0, 1, 3))          # (3,)
    pos_num, pos_sq, neg_sq = sums[0], sums[1], sums[2]

    total = jnp.float32(n * hw)          # pos_num + neg_num (mask is N*1*H*W)
    neg_num = total - pos_num

    pos_ratio = pos_num / total
    neg_ratio = 1.0 - pos_ratio

    # MSE over masked_select of the full NCHW tensors (= count * C elements).
    # NOTE: matches the PyTorch reference, which yields NaN if a side is empty.
    mse_neg = neg_sq / (neg_num * c)
    mse_pos = pos_sq / (pos_num * c)

    return pos_ratio * mse_neg + neg_ratio * mse_pos


def _reference(x, out_ae, out_seg):
    c = x.shape[1]
    pos = (out_seg > 0.5).astype(jnp.float32)          # (N,1,H,W)
    neg = 1.0 - pos
    pos_num = jnp.sum(pos)
    neg_num = jnp.sum(neg)
    pos_ratio = pos_num / (pos_num + neg_num)
    neg_ratio = 1.0 - pos_ratio
    d2 = (out_ae.astype(jnp.float32) - x.astype(jnp.float32)) ** 2
    mse_neg = jnp.sum(d2 * neg) / (neg_num * c)
    mse_pos = jnp.sum(d2 * pos) / (pos_num * c)
    return pos_ratio * mse_neg + neg_ratio * mse_pos


if __name__ == "__main__":
    key = jax.random.PRNGKey(0)
    k1, k2, k3 = jax.random.split(key, 3)

    n, c, h, w = 2, 4, 16, 16
    x = jax.random.normal(k1, (n, c, h, w), dtype=jnp.float32)
    out_ae = jax.random.normal(k2, (n, c, h, w), dtype=jnp.float32)
    out_seg = jax.random.uniform(k3, (n, 1, h, w), dtype=jnp.float32)

    loss = weighted_mse(x, out_ae, out_seg)
    jax.block_until_ready(loss)

    ref = _reference(x, out_ae, out_seg)
    assert jnp.allclose(loss, ref, rtol=1e-5, atol=1e-6), (loss, ref)

    print("KERNEL_OK")
</pallas_src>

<mosaic_0001>
module attributes {stable_mosaic.version = 11 : i64} {
  func.func @_wmse_kernel(%arg0: i32, %arg1: i32, %arg2: i32, %arg3: memref<1x4x8x128xf32, #tpu.memory_space<vmem>>, %arg4: memref<1x4x8x128xf32, #tpu.memory_space<vmem>>, %arg5: memref<1x1x8x128xf32, #tpu.memory_space<vmem>>, %arg6: memref<1x1x3x128xf32, #tpu.memory_space<vmem>>, %arg7: memref<3x8x128xf32, #tpu.memory_space<vmem>>) attributes {dimension_semantics = [#tpu.dimension_semantics<parallel>, #tpu.dimension_semantics<parallel>, #tpu.dimension_semantics<arbitrary>], iteration_bounds = array<i64: 2, 1, 1>, scalar_prefetch = 0 : i64, scratch_operands = 1 : i64, tpu.core_type = #tpu.core_type<tc>, window_params = [{transform_indices = @transform_0, window_bounds = array<i64: 1, 4, 8, 128>}, {transform_indices = @transform_1, window_bounds = array<i64: 1, 4, 8, 128>}, {transform_indices = @transform_2, window_bounds = array<i64: 1, 1, 8, 128>}, {transform_indices = @transform_3, window_bounds = array<i64: 1, 1, 3, 128>}]} {
    %c0_i32 = arith.constant 0 : i32
    %0 = arith.cmpi eq, %arg2, %c0_i32 : i32
    %1 = arith.extui %0 : i1 to i32
    %c0_i32_0 = arith.constant 0 : i32
    %2 = arith.cmpi ne, %1, %c0_i32_0 : i32
    scf.if %2 {
      %cst_33 = arith.constant 0.000000e+00 : f32
      %41 = vector.broadcast %cst_33 : f32 to vector<3x8x128xf32>
      %c0_34 = arith.constant 0 : index
      %c0_35 = arith.constant 0 : index
      %c0_36 = arith.constant 0 : index
      %42 = vector.load %arg7[%c0_34, %c0_35, %c0_36] : memref<3x8x128xf32, #tpu.memory_space<vmem>>, vector<3x8x128xf32>
      tpu.vector_store %arg7[%c0_34, %c0_35, %c0_36], %41 {strides = array<i32>} : memref<3x8x128xf32, #tpu.memory_space<vmem>>, vector<3x8x128xf32>,
    } else {
    }
    %c0 = arith.constant 0 : index
    %c0_1 = arith.constant 0 : index
    %c0_2 = arith.constant 0 : index
    %c0_3 = arith.constant 0 : index
    %3 = vector.load %arg5[%c0, %c0_1, %c0_2, %c0_3] : memref<1x1x8x128xf32, #tpu.memory_space<vmem>>, vector<1x1x8x128xf32>
    %4 = vector.shape_cast %3 : vector<1x1x8x128xf32> to vector<8x128xf32>
    %cst = arith.constant 5.000000e-01 : f32
    %5 = vector.broadcast %cst : f32 to vector<8x128xf32>
    %6 = arith.cmpf ogt, %4, %5 : vector<8x128xf32>
    %c0_4 = arith.constant 0 : index
    %c0_5 = arith.constant 0 : index
    %c0_6 = arith.constant 0 : index
    %c0_7 = arith.constant 0 : index
    %7 = vector.load %arg3[%c0_4, %c0_5, %c0_6, %c0_7] : memref<1x4x8x128xf32, #tpu.memory_space<vmem>>, vector<1x4x8x128xf32>
    %8 = vector.shape_cast %7 : vector<1x4x8x128xf32> to vector<4x8x128xf32>
    %c0_8 = arith.constant 0 : index
    %c0_9 = arith.constant 0 : index
    %c0_10 = arith.constant 0 : index
    %c0_11 = arith.constant 0 : index
    %9 = vector.load %arg4[%c0_8, %c0_9, %c0_10, %c0_11] : memref<1x4x8x128xf32, #tpu.memory_space<vmem>>, vector<1x4x8x128xf32>
    %10 = vector.shape_cast %9 : vector<1x4x8x128xf32> to vector<4x8x128xf32>
    %11 = arith.subf %10, %8 : vector<4x8x128xf32>
    %12 = arith.mulf %11, %11 : vector<4x8x128xf32>
    %cst_12 = arith.constant dense<0.000000e+00> : vector<8x128xf32>
    %13 = vector.multi_reduction <add>, %12, %cst_12 [0] : vector<4x8x128xf32> to vector<8x128xf32>
    %c0_13 = arith.constant 0 : index
    %c0_14 = arith.constant 0 : index
    %c0_15 = arith.constant 0 : index
    %14 = vector.load %arg7[%c0_13, %c0_14, %c0_15] : memref<3x8x128xf32, #tpu.memory_space<vmem>>, vector<1x8x128xf32>
    %15 = vector.shape_cast %14 : vector<1x8x128xf32> to vector<8x128xf32>
    %16 = arith.extui %6 : vector<8x128xi1> to vector<8x128xi32>
    %17 = arith.sitofp %16 : vector<8x128xi32> to vector<8x128xf32>
    %18 = arith.addf %15, %17 : vector<8x128xf32>
    %c0_16 = arith.constant 0 : index
    %c0_17 = arith.constant 0 : index
    %c0_18 = arith.constant 0 : index
    %19 = vector.load %arg7[%c0_16, %c0_17, %c0_18] : memref<3x8x128xf32, #tpu.memory_space<vmem>>, vector<1x8x128xf32>
    %20 = vector.shape_cast %19 : vector<1x8x128xf32> to vector<8x128xf32>
    %21 = vector.shape_cast %18 : vector<8x128xf32> to vector<1x8x128xf32>
    tpu.vector_store %arg7[%c0_16, %c0_17, %c0_18], %21 {strides = array<i32>} : memref<3x8x128xf32, #tpu.memory_space<vmem>>, vector<1x8x128xf32>,
    %c1 = arith.constant 1 : index
    %c0_19 = arith.constant 0 : index
    %c0_20 = arith.constant 0 : index
    %22 = vector.load %arg7[%c1, %c0_19, %c0_20] : memref<3x8x128xf32, #tpu.memory_space<vmem>>, vector<1x8x128xf32>
    %23 = vector.shape_cast %22 : vector<1x8x128xf32> to vector<8x128xf32>
    %cst_21 = arith.constant 0.000000e+00 : f32
    %24 = vector.broadcast %cst_21 : f32 to vector<8x128xf32>
    %25 = arith.select %6, %13, %24 : vector<8x128xi1>, vector<8x128xf32>
    %26 = arith.addf %23, %25 : vector<8x128xf32>
    %c1_22 = arith.constant 1 : index
    %c0_23 = arith.constant 0 : index
    %c0_24 = arith.constant 0 : index
    %27 = vector.load %arg7[%c1_22, %c0_23, %c0_24] : memref<3x8x128xf32, #tpu.memory_space<vmem>>, vector<1x8x128xf32>
    %28 = vector.shape_cast %27 : vector<1x8x128xf32> to vector<8x128xf32>
    %29 = vector.shape_cast %26 : vector<8x128xf32> to vector<1x8x128xf32>
    tpu.vector_store %arg7[%c1_22, %c0_23, %c0_24], %29 {strides = array<i32>} : memref<3x8x128xf32, #tpu.memory_space<vmem>>, vector<1x8x128xf32>,
    %c2 = arith.constant 2 : index
    %c0_25 = arith.constant 0 : index
    %c0_26 = arith.constant 0 : index
    %30 = vector.load %arg7[%c2, %c0_25, %c0_26] : memref<3x8x128xf32, #tpu.memory_space<vmem>>, vector<1x8x128xf32>
    %31 = vector.shape_cast %30 : vector<1x8x128xf32> to vector<8x128xf32>
    %cst_27 = arith.constant 0.000000e+00 : f32
    %32 = vector.broadcast %cst_27 : f32 to vector<8x128xf32>
    %33 = arith.select %6, %32, %13 : vector<8x128xi1>, vector<8x128xf32>
    %34 = arith.addf %31, %33 : vector<8x128xf32>
    %c2_28 = arith.constant 2 : index
    %c0_29 = arith.constant 0 : index
    %c0_30 = arith.constant 0 : index
    %35 = vector.load %arg7[%c2_28, %c0_29, %c0_30] : memref<3x8x128xf32, #tpu.memory_space<vmem>>, vector<1x8x128xf32>
    %36 = vector.shape_cast %35 : vector<1x8x128xf32> to vector<8x128xf32>
    %37 = vector.shape_cast %34 : vector<8x128xf32> to vector<1x8x128xf32>
    tpu.vector_store %arg7[%c2_28, %c0_29, %c0_30], %37 {strides = array<i32>} : memref<3x8x128xf32, #tpu.memory_space<vmem>>, vector<1x8x128xf32>,
    %c0_i32_31 = arith.constant 0 : i32
    %38 = arith.cmpi eq, %arg2, %c0_i32_31 : i32
    %39 = arith.extui %38 : i1 to i32
    %c0_i32_32 = arith.constant 0 : i32
    %40 = arith.cmpi ne, %39, %c0_i32_32 : i32
    scf.if %40 {
      %c0_33 = arith.constant 0 : index
      %c0_34 = arith.constant 0 : index
      %c0_35 = arith.constant 0 : index
      %41 = vector.load %arg7[%c0_33, %c0_34, %c0_35] : memref<3x8x128xf32, #tpu.memory_space<vmem>>, vector<3x8x128xf32>
      %cst_36 = arith.constant dense<0.000000e+00> : vector<3x128xf32>
      %42 = vector.multi_reduction <add>, %41, %cst_36 [1] : vector<3x8x128xf32> to vector<3x128xf32>
      %43 = vector.shape_cast %42 : vector<3x128xf32> to vector<1x1x3x128xf32>
      %c0_37 = arith.constant 0 : index
      %c0_38 = arith.constant 0 : index
      %c0_39 = arith.constant 0 : index
      %c0_40 = arith.constant 0 : index
      %44 = vector.load %arg6[%c0_37, %c0_38, %c0_39, %c0_40] : memref<1x1x3x128xf32, #tpu.memory_space<vmem>>, vector<1x1x3x128xf32>
      tpu.vector_store %arg6[%c0_37, %c0_38, %c0_39, %c0_40], %43 {strides = array<i32>} : memref<1x1x3x128xf32, #tpu.memory_space<vmem>>, vector<1x1x3x128xf32>,
    } else {
    }
    return
  }
  func.func @transform_0(%arg0: i32, %arg1: i32, %arg2: i32) -> (i32, i32, i32, i32) {
    %c1_i32 = arith.constant 1 : i32
    %0 = arith.muli %arg1, %c1_i32 : i32
    %1 = arith.addi %0, %arg2 : i32
    %c0_i32 = arith.constant 0 : i32
    %c0_i32_0 = arith.constant 0 : i32
    %c0_i32_1 = arith.constant 0 : i32
    return %arg0, %c0_i32, %1, %c0_i32_0 : i32, i32, i32, i32
  }
  func.func @transform_1(%arg0: i32, %arg1: i32, %arg2: i32) -> (i32, i32, i32, i32) {
    %c1_i32 = arith.constant 1 : i32
    %0 = arith.muli %arg1, %c1_i32 : i32
    %1 = arith.addi %0, %arg2 : i32
    %c0_i32 = arith.constant 0 : i32
    %c0_i32_0 = arith.constant 0 : i32
    %c0_i32_1 = arith.constant 0 : i32
    return %arg0, %c0_i32, %1, %c0_i32_0 : i32, i32, i32, i32
  }
  func.func @transform_2(%arg0: i32, %arg1: i32, %arg2: i32) -> (i32, i32, i32, i32) {
    %c1_i32 = arith.constant 1 : i32
    %0 = arith.muli %arg1, %c1_i32 : i32
    %1 = arith.addi %0, %arg2 : i32
    %c0_i32 = arith.constant 0 : i32
    %c0_i32_0 = arith.constant 0 : i32
    %c0_i32_1 = arith.constant 0 : i32
    return %arg0, %c0_i32, %1, %c0_i32_0 : i32, i32, i32, i32
  }
  func.func @transform_3(%arg0: i32, %arg1: i32, %arg2: i32) -> (i32, i32, i32, i32) {
    %c0_i32 = arith.constant 0 : i32
    %c0_i32_0 = arith.constant 0 : i32
    %c0_i32_1 = arith.constant 0 : i32
    return %arg0, %arg1, %c0_i32, %c0_i32_0 : i32, i32, i32, i32
  }
}

</mosaic_0001>

<bundles_post_ra>
// kernel: tpu_custom_call.1
= control target key start
LH: loop header
LB: loop body
LE: loop exit
PB: predicated region body
PF: predicated region fallthrough
CT: control target
= control target key end

     0   :  { %8 = vsyncpa [#allocation4], 0  ;;  %s1001_s0 = inlined_call_operand.hbm [shape: f32[2,4,8,128], index: 0, kind: input, shape index: {}]   ;;  %s1002_s1 = inlined_call_operand.hbm [shape: f32[2,4,8,128], index: 1, kind: input, shape index: {}]   ;;  %s1003_s2 = inlined_call_operand.hbm [shape: f32[2,1,8,128], index: 2, kind: input, shape index: {}]   ;;  %s1004_s3 = inlined_call_operand.vmem [shape: f32[2,1,3,128], index: 3, kind: output, shape index: {}]  }
   0x1   :  { %10 = vsyncpa [#allocation4 + $0x1], 0 }
   0x2   :  { %11 = vsyncpa [#allocation6], 0 }
   0x3   :  { %13 = vsyncpa [#allocation6 + $0x1], 0  ;;  %s786_s12 = smov 0   ;;  %s788_s13 = smov 0  }
   0x4   :  { %s790_s14 = smov 0   ;;  %s792_s15 = smov 0  }
   0x5   :  { %s794_s16 = smov 0   ;;  %s796_s17 = smov 0  }
   0x6 LB: > { %s1006_s18 = sadd.s32 4294967295, %s758_s17   ;;  %s38_s19 = sadd.s32 1, %s754_s16  ;;  %s758_s17 = sphi %s796_s17, %s19_s17   ;;  %s754_s16 = sphi %s794_s16, %s1021_s16   ;;  %s750_s15 = sphi %s792_s15, %s1020_s15   ;;  %s746_s14 = sphi %s790_s14, %s1019_s14   ;;  %s742_s13 = sphi %s788_s13, %s1018_s13   ;;  %s738_s12 = sphi %s786_s12, %s1017_s12  }
   0x7   : > { %p40_p0 = scmp.ge.s32.totalorder %s38_s19, 2  ;;  %s49_s20 = sadd.s32 1, %s746_s14 }
   0x8   : > { %p56_p1 = scmp.ne.s32.totalorder %s746_s14, %s742_s13  ;;  %p57_p2 = scmp.eq.s32.totalorder %s758_s17, 0 }
   0x9   : > { %s1023_s19 = smov (%p40_p0, %s38_s19), 0  ;;  %p62_p4 = scmp.ne.s32.totalorder %s742_s13, %s738_s12 }
   0xa   : > { %p58_p3 = por %p57_p2, %p56_p1  ;;  %s44_s21 = ssub.s32 %s754_s16, %s1023_s19 }
   0xb   : > { %p63_p5 = scmp.eq.s32.totalorder %s1006_s18, 0  ;;  %p47_p6 = scmp.eq.s32.totalorder %s44_s21, 0 }
   0xc   : > { %p562_p8 = scmp.lt.s32.totalorder %s758_s17, 2  ;;  %s836_s24 = sand.u32 1, %s746_s14  }
   0xd   : > { %p827_p7 = por %p63_p5, %p62_p4  ;;  %s544_s25 = sshll.u32 %s754_s16, 9 }
   0xe   : > { %s833_s23 = scalar_select %p47_p6, %s746_s14, %s49_s20  }
   0xf   : > { %s1008_s22 = scalar_select %p827_p7, 1, 0 }
  0x10   : > { %s528_s26 = sshll.u32 %s836_s24, 5  ;;  %p840_p9 = pnand %p562_p8, %p58_p3 }
  0x11   : > { %s197_s28 = sand.u32 1, %s758_s17   ;;  %s850_s4 = scalar_lea.hbm %s1002_s1, %s544_s25 }
  0x12   : > { %s1009_s27 = scalar_select %p840_p9, 1, 0 }
  0x13   : > { %s201_s5 = scalar_lea.vmem [#allocation5], %s528_s26  ;;  %s857_s7 = scalar_lea.sflag [#allocation6], %s197_s28 }
  0x14   : > { %s210_s6 = sshll.u32 %s201_s5, 4  ;;  %s614_s8 = scalar_lea.hbm %s850_s4, 512  ;;  %s854_s6 = int_to_ptr.vmem [resolvable:$true] %s210_s6 }
  0x15   : > { %p615_p11 = scmp.ne.s32.totalorder %s850_s4, %s614_s8  ;;  %p863_p12 = pneg %p840_p9 }
  0x16   : > { %s619_s12 = scalar_lea.hbm %s1002_s1, 1024  ;;  %p620_p1 = scmp.lt.u32.totalorder %s850_s4, %s1002_s1 }
  0x17   : > { %p617_p13 = pnand %p863_p12, %p615_p11  ;;  %p621_p2 = scmp.lt.u32.totalorder %s619_s12, %s614_s8 }
  0x18   : > { %p623_p4 = scmp.lt.u32.totalorder %s614_s8, %s850_s4 }
  0x19   : > { %p618_p0 = pneg %p617_p13  ;;  %p622_p3 = por %p621_p2, %p620_p1 }
  0x1b   : > { %p624_p5 = por %p623_p4, %p622_p3 }
  0x1d   : > { %p625_p6 = pnand %p624_p5, %p618_p0 }
  0x1f   : > { %628 = shalt.err (!%p625_p6)
}
  0x20   : > { %s629_s28 = scalar_lea.vmem %s854_s6, 512  ;;  %s760_s29 = smov [#allocation5]  }
  0x21   : > { %p630_p8 = scmp.ne.s32.totalorder %s854_s6, %s629_s28  ;;  %s634_s30 = sshll.u32 %s760_s29, 4  ;;  %s635_s30 = int_to_ptr.vmem [resolvable:$false] %s634_s30 }
  0x22   : > { %s636_s5 = scalar_lea.vmem %s635_s30, 1024  ;;  %p637_p10 = scmp.lt.s32.totalorder %s854_s6, %s635_s30 }
  0x23   : > { %p632_p11 = pnand %p630_p8, %p863_p12  ;;  %p638_p7 = scmp.lt.s32.totalorder %s636_s5, %s629_s28 }
  0x25   : > { %p633_p13 = pneg %p632_p11  ;;  %p639_p1 = por %p638_p7, %p637_p10 }
  0x27   : > { %p640_p2 = pnand %p639_p1, %p633_p13 }
  0x29   : > { %643 = shalt.err (!%p640_p2)
}
  0x2a   : > { %s761_s8 = smov 128   ;;  %s762_s10 = smov 8  }
  0x2b   : > { %558 = dma.hbm_to_vmem [thread:$0]  (!%p840_p9), %s850_s4, 512, %s854_s6, %s857_s7, %s761_s8, %s761_s8, %s762_s10  }
  0x2c   : > { %p238_p7 = scmp.lt.s32.totalorder %s758_s17, 3  ;;  %p1011_p10 = scmp.ge.s32.totalorder %s758_s17, 1 }
  0x2d   : > { %s902_s21 = scalar_lea.hbm %s1001_s0, %s544_s25  ;;  %s178_s28 = scalar_lea.vmem [#allocation3], %s528_s26 }
  0x2e   : > { %p893_p0 = pnand %p1011_p10, %p238_p7  ;;  %s187_s29 = sshll.u32 %s178_s28, 4  ;;  %s906_s29 = int_to_ptr.vmem [resolvable:$true] %s187_s29 }
  0x2f   : > { %s534_s4 = sshll.u32 %s836_s24, 3  ;;  %s175_s6 = scalar_lea.sflag [#allocation4], %s836_s24 }
  0x30   : > { %s1012_s11 = scalar_select %p893_p0, 1, 0 }
  0x31   : > { %s644_s30 = scalar_lea.hbm %s902_s21, 512  ;;  %s649_s25 = scalar_lea.hbm %s1001_s0, 1024 }
  0x32   : > { %p645_p3 = scmp.ne.s32.totalorder %s902_s21, %s644_s30  ;;  %p650_p6 = scmp.lt.u32.totalorder %s902_s21, %s1001_s0 }
  0x33   : > { %p651_p8 = scmp.lt.u32.totalorder %s649_s25, %s644_s30  ;;  %p653_p13 = scmp.lt.u32.totalorder %s644_s30, %s902_s21 }
  0x34   : > { %p647_p4 = pnand %p645_p3, %p863_p12 }
  0x35   : > { %p652_p11 = por %p651_p8, %p650_p6 }
  0x36   : > { %p648_p5 = pneg %p647_p4 }
  0x37   : > { %p654_p1 = por %p653_p13, %p652_p11 }
  0x39   : > { %p655_p2 = pnand %p654_p1, %p648_p5 }
  0x3b   : > { %658 = shalt.err (!%p655_p2)
}
  0x3c   : > { %s659_s26 = scalar_lea.vmem %s906_s29, 512  ;;  %s763_s28 = smov [#allocation3]  }
  0x3d   : > { %p660_p7 = scmp.ne.s32.totalorder %s906_s29, %s659_s26  ;;  %s664_s5 = sshll.u32 %s763_s28, 4  ;;  %s665_s5 = int_to_ptr.vmem [resolvable:$false] %s664_s5 }
  0x3e   : > { %s666_s18 = scalar_lea.vmem %s665_s5, 1024  ;;  %p667_p4 = scmp.lt.s32.totalorder %s906_s29, %s665_s5 }
  0x3f   : > { %p662_p10 = pnand %p660_p7, %p863_p12  ;;  %p668_p0 = scmp.lt.s32.totalorder %s666_s18, %s659_s26 }
  0x41   : > { %p663_p3 = pneg %p662_p10  ;;  %p669_p6 = por %p668_p0, %p667_p4 }
  0x43   : > { %p670_p8 = pnand %p669_p6, %p663_p3 }
  0x45   : > { %673 = shalt.err (!%p670_p8)
}
  0x46   : > { %555 = dma.hbm_to_vmem [thread:$0]  (!%p840_p9), %s902_s21, 512, %s906_s29, %s175_s6, %s761_s8, %s761_s8, %s762_s10  }
  0x47   : > { %s535_s30 = sshll.u32 %s754_s16, 7  ;;  %s224_s26 = scalar_lea.vmem [#allocation7], %s534_s4 }
  0x48   : > { %s940_s20 = scalar_lea.hbm %s1003_s2, %s535_s30  ;;  %s233_s28 = sshll.u32 %s224_s26, 4  ;;  %s234_s28 = int_to_ptr.vmem [resolvable:$true] %s233_s28 }
  0x49   : > { %s674_s5 = scalar_lea.hbm %s940_s20, 128  ;;  %s679_s21 = scalar_lea.hbm %s1003_s2, 256 }
  0x4a   : > { %p675_p0 = scmp.ne.s32.totalorder %s940_s20, %s674_s5  ;;  %p680_p13 = scmp.lt.u32.totalorder %s940_s20, %s1003_s2 }
  0x4b   : > { %p681_p1 = scmp.lt.u32.totalorder %s679_s21, %s674_s5  ;;  %p683_p7 = scmp.lt.u32.totalorder %s674_s5, %s940_s20 }
  0x4c   : > { %p677_p5 = pnand %p675_p0, %p863_p12 }
  0x4d   : > { %p682_p2 = por %p681_p1, %p680_p13 }
  0x4e   : > { %p678_p11 = pneg %p677_p5 }
  0x4f   : > { %p684_p10 = por %p683_p7, %p682_p2 }
  0x51   : > { %p685_p3 = pnand %p684_p10, %p678_p11 }
  0x53   : > { %688 = shalt.err (!%p685_p3)
}
  0x54   : > { %s689_s24 = scalar_lea.vmem %s234_s28, 128  ;;  %s764_s4 = smov [#allocation7]  }
  0x55   : > { %p690_p4 = scmp.ne.s32.totalorder %s234_s28, %s689_s24  ;;  %s694_s18 = sshll.u32 %s764_s4, 4  ;;  %s695_s18 = int_to_ptr.vmem [resolvable:$false] %s694_s18 }
  0x56   : > { %s696_s30 = scalar_lea.vmem %s695_s18, 256  ;;  %p697_p0 = scmp.lt.s32.totalorder %s234_s28, %s695_s18 }
  0x57   : > { %p692_p6 = pnand %p690_p4, %p863_p12  ;;  %p698_p5 = scmp.lt.s32.totalorder %s696_s30, %s689_s24 }
  0x59   : > { %p693_p8 = pneg %p692_p6  ;;  %p699_p9 = por %p698_p5, %p697_p0 }
  0x5b   : > { %p700_p1 = pnand %p699_p9, %p693_p8 }
  0x5d   : > { %703 = shalt.err (!%p700_p1)
}
  0x5e   : > { %p1013_p13 = scmp.ne.s32.totalorder %s1009_s27, 0  ;;  %p1014_p11 = scmp.ne.s32.totalorder %s1012_s11, 0 }
  0x5f   : > { %s244_s9 = sand.u32 (!%p1014_p11), 1, %s742_s13   ;;  %p1015_p12 = scmp.ne.s32.totalorder (!%p1014_p11), %s1008_s22, 0 }
  0x60   : > { %561 = dma.hbm_to_vmem [thread:$0]  (!%p1013_p13), %s940_s20, 128, %s234_s28, %s857_s7  }
  0x61   : > { %242 = sbr.rel (%p1014_p11) target bundleno = 139 (0x8b), region = 32  ;;  %s537_s12 = sshll.u32 (!%p1014_p11), %s244_s9, 5 }
  0x62   : > { %s245_s25 = scalar_lea.sflag (!%p1014_p11), [#allocation4], %s244_s9  ;;  %s248_s26 = scalar_lea.vmem (!%p1014_p11), [#allocation3], %s537_s12 }
  0x68   : > { %729 = dma.done.wait (%p1015_p12), %s245_s25, 512  }
  0x69   : > { %731 = vsyncadd (%p1015_p12), %s245_s25, 4294966784  ;;  %s1016_s5 = sadd.s32 4294967295, %s758_s17   ;;  %s257_s7 = scalar_lea.vmem [#allocation5], %s537_s12 }
  0x6a   : > { %s253_s27 = sand.u32 1, %s1016_s5  }
  0x6b   : > { %s254_s8 = scalar_lea.sflag [#allocation6], %s253_s27 }
  0x6c   : > { %733 = dma.done.wait (%p1015_p12), %s254_s8, 640  }
  0x6d   : > { %735 = vsyncadd (%p1015_p12), %s254_s8, 4294966656  ;;  %s539_s11 = sshll.u32 %s244_s9, 3  ;;  %v320_v1 = vld [vmem:[%s248_s26] sm:$0xff]  ;;  %v321_v2 = vld [vmem:[%s248_s26 + $0x8] sm:$0xff]  ;;  %v765_v10 = vmov 0.0   ;;  %p304_p9 = scmp.lt.s32.totalorder %s750_s15, 1 }
  0x6e   : > { %s266_s20 = scalar_lea.vmem [#allocation7], %s539_s11  ;;  %v322_v3 = vld [vmem:[%s248_s26 + $0x10] sm:$0xff]  ;;  %v323_v4 = vld [vmem:[%s248_s26 + $0x18] sm:$0xff]  ;;  %v324_v5 = vld [vmem:[%s257_s7] sm:$0xff]  ;;  %vm381_vm1 = vcmask 1041409   ;;  %vm383_vm2 = vcmask 1042434  }
  0x6f   : > { %v318_v0 = vld [vmem:[%s266_s20] sm:$0xff]  ;;  %v326_v7 = vld [vmem:[%s257_s7 + $0x10] sm:$0xff]  ;;  %v327_v8 = vld [vmem:[%s257_s7 + $0x18] sm:$0xff]  ;;  %v328_v9 = vsub.f32 %v324_v5, %v320_v1  ;;  %s1025_s15 = smov (!%p304_p9, %s750_s15), 1 }
  0x70   : > { %vm319_vm0 = vcmp.gt.f32.partialorder %v318_v0, 0.5  ;;  %v325_v6 = vld [vmem:[%s257_s7 + $0x8] sm:$0xff]  ;;  %v330_v13 = vsub.f32 %v326_v7, %v322_v3  ;;  %v331_v14 = vsub.f32 %v327_v8, %v323_v4  ;;  %s540_s22 = sshll.u32 %s1025_s15, 2 }
  0x71   : > { %v541_v11 = vsel %vm319_vm0, 1.0, %v765_v10  ;;  %v329_v12 = vsub.f32 %v325_v6, %v321_v2  ;;  %v332_v16 = vmul.f32 %v328_v9, %v328_v9  ;;  %s310_s21 = scalar_lea.vmem %s1004_s3, %s540_s22 }
  0x72   : > { %v360_v15 = vrot.slane %v541_v11, 4  ;;  %v334_v18 = vmul.f32 %v330_v13, %v330_v13  ;;  %v335_v20 = vmul.f32 %v331_v14, %v331_v14 }
  0x73   : > { %v333_v17 = vmul.f32 %v329_v12, %v329_v12 }
  0x74   : > { %v361_v19 = vadd.f32 %v541_v11, %v360_v15 }
  0x75   : > { %v336_v21 = vadd.f32 %v333_v17, %v332_v16 }
  0x76   : > { %v362_v23 = vrot.slane %v361_v19, 2 }
  0x77   : > { %v337_v22 = vadd.f32 %v336_v21, %v334_v18 }
  0x78   : > { %v363_v27 = vadd.f32 %v362_v23, %v361_v19 }
  0x79   : > { %v338_v24 = vadd.f32 %v337_v22, %v335_v20 }
  0x7a   : > { %v364_v32 = vrot.slane %v363_v27, 1 }
  0x7b   : > { %v346_v25 = vsel %vm319_vm0, %v338_v24, 0.0  ;;  %v351_v26 = vsel %vm319_vm0, 0.0, %v338_v24 }
  0x7c   : > { %v366_v28 = vrot.slane %v346_v25, 4  ;;  %v372_v29 = vrot.slane %v351_v26, 4  ;;  %v365_v37 = vadd.f32 %v364_v32, %v363_v27 }
  0x7e   : > { %v367_v30 = vadd.f32 %v366_v28, %v346_v25  ;;  %v373_v31 = vadd.f32 %v372_v29, %v351_v26 }
  0x80   : > { %v368_v33 = vrot.slane %v367_v30, 2  ;;  %v374_v34 = vrot.slane %v373_v31, 2 }
  0x82   : > { %v369_v35 = vadd.f32 %v368_v33, %v367_v30  ;;  %v375_v36 = vadd.f32 %v374_v34, %v373_v31 }
  0x84   : > { %v370_v38 = vrot.slane %v369_v35, 1  ;;  %v376_v39 = vrot.slane %v375_v36, 1 }
  0x86   : > { %v371_v40 = vadd.f32 %v370_v38, %v369_v35  ;;  %v377_v41 = vadd.f32 %v376_v39, %v375_v36 }
  0x88   : > { %v382_v42 = vsel %vm381_vm1, %v371_v40, %v365_v37 }
  0x89   : > { %v384_v43 = vsel %vm383_vm2, %v377_v41, %v382_v42 }
  0x8a   : > { %386 = vst [vmem:[%s310_s21] sm:$0x7] %v384_v43 }
  0x8b PF: > { %s19_s17 = sadd.s32 1, %s758_s17   ;;  %s1017_s12 = smov %s742_s13 }
  0x8c   : > { %p16_p2 = scmp.ge.s32.totalorder %s19_s17, 4   ;;  %s1018_s13 = smov %s746_s14 }
  0x8d   : > { %s1019_s14 = smov %s833_s23  ;;  %s1020_s15 = smov %s754_s16 }
  0x8e   : > { %s1021_s16 = smov %s1023_s19  ;;  %18 = sbr.rel (!%p16_p2) target bundleno = 6 (0x6), region = 106 }
  0x95   :  { %412 = vsyncpa [#allocation4], 1 }
  0x96   :  { %414 = vsyncpa [#allocation4 + $0x1], 1 }
  0x97   :  { %415 = vsyncpa [#allocation6], 1 }
  0x98   :  { %417 = vsyncpa [#allocation6 + $0x1], 1 }

</bundles_post_ra>
